<compile_context>
chip_gen: v7x
topology: tpu7x:2x2x1
jax: 0.10.0
libtpu: 0.0.40
codegen_flags: <defaults>
</compile_context>

<pallas_src>
import functools

import jax
import jax.numpy as jnp
from jax.experimental import pallas as pl
from jax.experimental.pallas import tpu as pltpu

LOG_STD_MIN = -5.0
LOG_STD_MAX = 2.0


def _round_up(n, m):
    return (n + m - 1) // m * m


# --------------------------------------------------------------------------- #
# Kernel
# --------------------------------------------------------------------------- #
def actor_kernel(x_ref, w0_ref, b0_ref, w1_ref, b1_ref, wh_ref, bh_ref,
                 out_ref, *, action_dim):
    # fc0 + ReLU — full f32 matmul (K = obs_dim is tiny: MXU cost negligible,
    # keeps raw-observation precision).
    h = jnp.dot(x_ref[...], w0_ref[...],
                preferred_element_type=jnp.float32) + b0_ref[...]
    h = jnp.maximum(h, 0.0)

    # fc1 + ReLU — bf16 MXU operands, f32 accumulation.
    h = jnp.dot(h.astype(jnp.bfloat16), w1_ref[...],
                preferred_element_type=jnp.float32) + b1_ref[...]
    h = jnp.maximum(h, 0.0)

    # Fused, lane-padded heads: [mean | log_std | zero pad] in one (H, 128)
    # matmul -> a single lane-dense output slab.
    head = jnp.dot(h.astype(jnp.bfloat16), wh_ref[...],
                   preferred_element_type=jnp.float32) + bh_ref[...]

    # tanh squash + affine only on the log_std lanes; the lane mask keeps the
    # store one unmasked, lane-dense (TB, 128) write (no sub-128 slicing).
    squashed = LOG_STD_MIN + 0.5 * (LOG_STD_MAX - LOG_STD_MIN) * (jnp.tanh(head) + 1.0)
    lane = jax.lax.broadcasted_iota(jnp.int32, head.shape, 1)
    is_logstd = (lane >= action_dim) & (lane < 2 * action_dim)
    out_ref[...] = jnp.where(is_logstd, squashed, head).astype(out_ref.dtype)


# --------------------------------------------------------------------------- #
# Parameter packing (hoisted out of the per-call forward path)
# --------------------------------------------------------------------------- #
def pack_params(params):
    """One-time conversion of raw (PyTorch-style) params into kernel layout:
    f32 fc0, bf16 fc1, and the two heads fused + zero-padded to 128 lanes."""
    action_dim = params["wm"].shape[1]
    hidden_dim = params["w0"].shape[1]
    head_pad = max(128, _round_up(2 * action_dim, 128))

    def bias2d(b):
        return jnp.asarray(b, jnp.float32).reshape(1, -1)

    wh = jnp.zeros((hidden_dim, head_pad), jnp.bfloat16)
    wh = wh.at[:, :action_dim].set(params["wm"].astype(jnp.bfloat16))
    wh = wh.at[:, action_dim:2 * action_dim].set(params["wl"].astype(jnp.bfloat16))
    bh = jnp.zeros((1, head_pad), jnp.float32)
    bh = bh.at[:, :action_dim].set(bias2d(params["bm"])[0])
    bh = bh.at[:, action_dim:2 * action_dim].set(bias2d(params["bl"])[0])

    return dict(
        w0=jnp.asarray(params["w0"], jnp.float32),   # f32 first layer
        b0=bias2d(params["b0"]),
        w1=params["w1"].astype(jnp.bfloat16),
        b1=bias2d(params["b1"]),
        wh=wh,
        bh=bh,
        action_dim=int(action_dim),                  # static meta (Python int)
    )


# --------------------------------------------------------------------------- #
# Forward wrapper
# --------------------------------------------------------------------------- #
def actor_forward(x, packed, *, block_rows=1024):
    """Actor forward: returns (mean, log_std), each (B, action_dim) f32.
    `packed` must come from pack_params()."""
    x = x.astype(jnp.float32)
    B, obs_dim = x.shape
    w0, b0 = packed["w0"], packed["b0"]
    w1, b1 = packed["w1"], packed["b1"]
    wh, bh = packed["wh"], packed["bh"]
    hidden_dim = w0.shape[1]
    head_pad = wh.shape[1]
    action_dim = packed["action_dim"]

    # Batch tile: whole batch in one step when modest (overhead-bound regime);
    # otherwise >= 2 grid steps so v7x can shard the "parallel" axis over 2 TCs.
    B8 = _round_up(max(B, 1), 8)
    if B8 <= block_rows:
        TB = B8
    else:
        TB = min(block_rows, _round_up(pl.cdiv(B8, 2), 8))
    Bp = _round_up(B, TB)
    if Bp != B:
        x = jnp.pad(x, ((0, Bp - B), (0, 0)))
    grid = (Bp // TB,)

    weights = (w0, b0, w1, b1, wh, bh)
    weight_bytes = sum(int(a.size) * a.dtype.itemsize for a in weights)

    # VMEM budget: double-buffered streamed blocks + f32 intermediates +
    # single-buffered resident weights, with 2x headroom, capped at 48 MiB
    # (safe on v7x's 64 MiB physical VMEM; v5e/v6e have 128 MiB).
    vmem_need = (
        2 * TB * obs_dim * 4
        + 2 * TB * head_pad * 4
        + 3 * TB * hidden_dim * 4
        + weight_bytes
    )
    vmem_limit = int(min(max(2 * vmem_need, 32 * 1024 * 1024), 48 * 1024 * 1024))

    flops = 2 * Bp * (obs_dim * hidden_dim
                      + hidden_dim * hidden_dim
                      + hidden_dim * head_pad)
    bytes_accessed = Bp * obs_dim * 4 + weight_bytes + Bp * head_pad * 4

    def run(single_buffer_weights):
        def resident(a):
            # Constant-index weight block: stays VMEM-resident across grid
            # steps; single buffer suffices (no re-fetch between iterations).
            if single_buffer_weights:
                return pl.BlockSpec(a.shape, lambda i: (0, 0),
                                    pipeline_mode=pl.Buffered(1))
            return pl.BlockSpec(a.shape, lambda i: (0, 0))

        return pl.pallas_call(
            functools.partial(actor_kernel, action_dim=action_dim),
            out_shape=jax.ShapeDtypeStruct((Bp, head_pad), jnp.float32),
            grid=grid,
            in_specs=[
                pl.BlockSpec((TB, obs_dim), lambda i: (i, 0)),  # x: streamed
                resident(w0), resident(b0),
                resident(w1), resident(b1),
                resident(wh), resident(bh),
            ],
            out_specs=pl.BlockSpec((TB, head_pad), lambda i: (i, 0)),
            compiler_params=pltpu.CompilerParams(
                dimension_semantics=("parallel",),   # 2 TCs on v7x when grid>=2
                vmem_limit_bytes=vmem_limit,
            ),
            cost_estimate=pl.CostEstimate(
                flops=int(flops),
                transcendentals=int(Bp * head_pad),  # tanh on all output lanes
                bytes_accessed=int(bytes_accessed),
            ),
        )(x, w0, b0, w1, b1, wh, bh)

    try:
        out = run(single_buffer_weights=True)
    except Exception:  # pl.Buffered(1) unsupported on this jax -> default bufs
        out = run(single_buffer_weights=False)

    mean = out[:B, :action_dim]
    log_std = out[:B, action_dim:2 * action_dim]
    return mean, log_std


# --------------------------------------------------------------------------- #
# Init + references
# --------------------------------------------------------------------------- #
def init_params(key, obs_dim, action_dim, hidden_dim=256):
    """PyTorch nn.Linear-style init (uniform +/- 1/sqrt(fan_in)).
    Weights stored (in_features, out_features); biases (1, out_features)."""
    def linear(key, fan_in, fan_out):
        kw, kb = jax.random.split(key)
        bound = 1.0 / jnp.sqrt(fan_in)
        w = jax.random.uniform(kw, (fan_in, fan_out), jnp.float32, -bound, bound)
        b = jax.random.uniform(kb, (1, fan_out), jnp.float32, -bound, bound)
        return w, b

    k0, k1, k2, k3 = jax.random.split(key, 4)
    w0, b0 = linear(k0, obs_dim, hidden_dim)
    w1, b1 = linear(k1, hidden_dim, hidden_dim)
    wm, bm = linear(k2, hidden_dim, action_dim)
    wl, bl = linear(k3, hidden_dim, action_dim)
    return dict(w0=w0, b0=b0, w1=w1, b1=b1, wm=wm, bm=bm, wl=wl, bl=bl)


def actor_forward_ref_f32(x, p):
    """Pure-f32 JAX reference (matches the PyTorch module's math)."""
    hp = jax.lax.Precision.HIGHEST
    h = jnp.maximum(jnp.dot(x, p["w0"], precision=hp) + p["b0"], 0.0)
    h = jnp.maximum(jnp.dot(h, p["w1"], precision=hp) + p["b1"], 0.0)
    mean = jnp.dot(h, p["wm"], precision=hp) + p["bm"]
    ls = jnp.tanh(jnp.dot(h, p["wl"], precision=hp) + p["bl"])
    ls = LOG_STD_MIN + 0.5 * (LOG_STD_MAX - LOG_STD_MIN) * (ls + 1.0)
    return mean, ls


def actor_forward_ref_mixed(x, p):
    """Mirrors the kernel's precision path: f32 fc0, bf16 fc1/head matmuls."""
    def mm_bf16(a, w):
        return jnp.dot(a.astype(jnp.bfloat16), w.astype(jnp.bfloat16),
                       preferred_element_type=jnp.float32)
    h = jnp.maximum(jnp.dot(x, p["w0"], precision=jax.lax.Precision.HIGHEST)
                    + p["b0"], 0.0)
    h = jnp.maximum(mm_bf16(h, p["w1"]) + p["b1"], 0.0)
    mean = mm_bf16(h, p["wm"]) + p["bm"]
    ls = jnp.tanh(mm_bf16(h, p["wl"]) + p["bl"])
    ls = LOG_STD_MIN + 0.5 * (LOG_STD_MAX - LOG_STD_MIN) * (ls + 1.0)
    return mean, ls


# --------------------------------------------------------------------------- #
if __name__ == "__main__":
    # Small demo shapes consistent with the module: obs_dim=16, action_dim=4,
    # hidden_dim=32, batch=2.  (For real SAC perf keep hidden_dim a multiple of
    # 256 — the default hidden_dim=256 fully feeds the MXU.)
    B, OBS_DIM, ACTION_DIM, HIDDEN_DIM = 2, 16, 4, 32

    key = jax.random.PRNGKey(0)
    kx, kp = jax.random.split(key)
    x = jax.random.normal(kx, (B, OBS_DIM), dtype=jnp.float32)
    params = init_params(kp, OBS_DIM, ACTION_DIM, HIDDEN_DIM)

    packed = pack_params(params)          # one-time weight packing (hoisted)
    mean, log_std = actor_forward(x, packed)
    jax.block_until_ready((mean, log_std))

    # Check vs a reference that uses the same mixed-precision path.
    mean_m, ls_m = actor_forward_ref_mixed(x, params)
    assert jnp.allclose(mean, mean_m, atol=2e-2, rtol=2e-2)
    assert jnp.allclose(log_std, ls_m, atol=2e-2, rtol=2e-2)

    # Looser check vs the pure-f32 module semantics (bf16 matmul precision).
    mean_f, ls_f = actor_forward_ref_f32(x, params)
    assert jnp.allclose(mean, mean_f, atol=6e-2, rtol=6e-2)
    assert jnp.allclose(log_std, ls_f, atol=6e-2, rtol=6e-2)

    assert log_std.min() >= LOG_STD_MIN and log_std.max() <= LOG_STD_MAX
    assert mean.shape == (B, ACTION_DIM) and log_std.shape == (B, ACTION_DIM)

    print("KERNEL_OK")
</pallas_src>

<mosaic_0001>
module attributes {stable_mosaic.version = 11 : i64} {
  func.func @actor_kernel(%arg0: i32, %arg1: memref<8x16xf32, #tpu.memory_space<vmem>>, %arg2: memref<16x32xf32, #tpu.memory_space<vmem>>, %arg3: memref<1x32xf32, #tpu.memory_space<vmem>>, %arg4: memref<32x32xbf16, #tpu.memory_space<vmem>>, %arg5: memref<1x32xf32, #tpu.memory_space<vmem>>, %arg6: memref<32x128xbf16, #tpu.memory_space<vmem>>, %arg7: memref<1x128xf32, #tpu.memory_space<vmem>>, %arg8: memref<8x128xf32, #tpu.memory_space<vmem>>) attributes {dimension_semantics = [#tpu.dimension_semantics<parallel>], iteration_bounds = array<i64: 1>, scalar_prefetch = 0 : i64, scratch_operands = 0 : i64, tpu.core_type = #tpu.core_type<tc>, window_params = [{transform_indices = @transform_0, window_bounds = array<i64: 8, 16>}, {pipeline_mode = #tpu.pipeline_mode<synchronous>, transform_indices = @transform_1, window_bounds = array<i64: 16, 32>}, {pipeline_mode = #tpu.pipeline_mode<synchronous>, transform_indices = @transform_2, window_bounds = array<i64: 1, 32>}, {pipeline_mode = #tpu.pipeline_mode<synchronous>, transform_indices = @transform_3, window_bounds = array<i64: 32, 32>}, {pipeline_mode = #tpu.pipeline_mode<synchronous>, transform_indices = @transform_4, window_bounds = array<i64: 1, 32>}, {pipeline_mode = #tpu.pipeline_mode<synchronous>, transform_indices = @transform_5, window_bounds = array<i64: 32, 128>}, {pipeline_mode = #tpu.pipeline_mode<synchronous>, transform_indices = @transform_6, window_bounds = array<i64: 1, 128>}, {transform_indices = @transform_7, window_bounds = array<i64: 8, 128>}]} {
    %c0 = arith.constant 0 : index
    %c0_0 = arith.constant 0 : index
    %0 = vector.load %arg1[%c0, %c0_0] : memref<8x16xf32, #tpu.memory_space<vmem>>, vector<8x16xf32>
    %c0_1 = arith.constant 0 : index
    %c0_2 = arith.constant 0 : index
    %1 = vector.load %arg2[%c0_1, %c0_2] : memref<16x32xf32, #tpu.memory_space<vmem>>, vector<16x32xf32>
    %cst = arith.constant dense<0.000000e+00> : vector<8x32xf32>
    %2 = tpu.matmul %0, %1, %cst {dimension_numbers = #tpu.dot_dimension_numbers<[1], [0], [0], [1], [0, 0, 1, 1], [], []>} : vector<8x16xf32>, vector<16x32xf32>, vector<8x32xf32> -> vector<8x32xf32>
    %c0_3 = arith.constant 0 : index
    %c0_4 = arith.constant 0 : index
    %3 = vector.load %arg3[%c0_3, %c0_4] : memref<1x32xf32, #tpu.memory_space<vmem>>, vector<1x32xf32>
    %4 = vector.broadcast %3 : vector<1x32xf32> to vector<8x32xf32>
    %5 = arith.addf %2, %4 : vector<8x32xf32>
    %cst_5 = arith.constant 0.000000e+00 : f32
    %6 = vector.broadcast %cst_5 : f32 to vector<8x32xf32>
    %7 = arith.maximumf %5, %6 : vector<8x32xf32>
    %8 = arith.truncf %7 : vector<8x32xf32> to vector<8x32xbf16>
    %c0_6 = arith.constant 0 : index
    %c0_7 = arith.constant 0 : index
    %9 = vector.load %arg4[%c0_6, %c0_7] : memref<32x32xbf16, #tpu.memory_space<vmem>>, vector<32x32xbf16>
    %cst_8 = arith.constant dense<0.000000e+00> : vector<8x32xf32>
    %10 = tpu.matmul %8, %9, %cst_8 {dimension_numbers = #tpu.dot_dimension_numbers<[1], [0], [0], [1], [0, 0, 1, 1], [], []>} : vector<8x32xbf16>, vector<32x32xbf16>, vector<8x32xf32> -> vector<8x32xf32>
    %c0_9 = arith.constant 0 : index
    %c0_10 = arith.constant 0 : index
    %11 = vector.load %arg5[%c0_9, %c0_10] : memref<1x32xf32, #tpu.memory_space<vmem>>, vector<1x32xf32>
    %12 = vector.broadcast %11 : vector<1x32xf32> to vector<8x32xf32>
    %13 = arith.addf %10, %12 : vector<8x32xf32>
    %cst_11 = arith.constant 0.000000e+00 : f32
    %14 = vector.broadcast %cst_11 : f32 to vector<8x32xf32>
    %15 = arith.maximumf %13, %14 : vector<8x32xf32>
    %16 = arith.truncf %15 : vector<8x32xf32> to vector<8x32xbf16>
    %c0_12 = arith.constant 0 : index
    %c0_13 = arith.constant 0 : index
    %17 = vector.load %arg6[%c0_12, %c0_13] : memref<32x128xbf16, #tpu.memory_space<vmem>>, vector<32x128xbf16>
    %cst_14 = arith.constant dense<0.000000e+00> : vector<8x128xf32>
    %18 = tpu.matmul %16, %17, %cst_14 {dimension_numbers = #tpu.dot_dimension_numbers<[1], [0], [0], [1], [0, 0, 1, 1], [], []>} : vector<8x32xbf16>, vector<32x128xbf16>, vector<8x128xf32> -> vector<8x128xf32>
    %c0_15 = arith.constant 0 : index
    %c0_16 = arith.constant 0 : index
    %19 = vector.load %arg7[%c0_15, %c0_16] : memref<1x128xf32, #tpu.memory_space<vmem>>, vector<1x128xf32>
    %20 = vector.broadcast %19 : vector<1x128xf32> to vector<8x128xf32>
    %21 = arith.addf %18, %20 : vector<8x128xf32>
    %22 = math.tanh %21 : vector<8x128xf32>
    %cst_17 = arith.constant 1.000000e+00 : f32
    %23 = vector.broadcast %cst_17 : f32 to vector<8x128xf32>
    %24 = arith.addf %22, %23 : vector<8x128xf32>
    %cst_18 = arith.constant 3.500000e+00 : f32
    %25 = vector.broadcast %cst_18 : f32 to vector<8x128xf32>
    %26 = arith.mulf %25, %24 : vector<8x128xf32>
    %cst_19 = arith.constant -5.000000e+00 : f32
    %27 = vector.broadcast %cst_19 : f32 to vector<8x128xf32>
    %28 = arith.addf %27, %26 : vector<8x128xf32>
    %29 = tpu.iota {dimensions = array<i32: 1>} : vector<8x128xi32>
    %c4_i32 = arith.constant 4 : i32
    %30 = vector.broadcast %c4_i32 : i32 to vector<8x128xi32>
    %31 = arith.cmpi sge, %29, %30 : vector<8x128xi32>
    %c8_i32 = arith.constant 8 : i32
    %32 = vector.broadcast %c8_i32 : i32 to vector<8x128xi32>
    %33 = arith.cmpi slt, %29, %32 : vector<8x128xi32>
    %34 = arith.andi %31, %33 : vector<8x128xi1>
    %35 = arith.select %34, %28, %21 : vector<8x128xi1>, vector<8x128xf32>
    %c0_20 = arith.constant 0 : index
    %c0_21 = arith.constant 0 : index
    %36 = vector.load %arg8[%c0_20, %c0_21] : memref<8x128xf32, #tpu.memory_space<vmem>>, vector<8x128xf32>
    tpu.vector_store %arg8[%c0_20, %c0_21], %35 {strides = array<i32>} : memref<8x128xf32, #tpu.memory_space<vmem>>, vector<8x128xf32>,
    return
  }
  func.func @transform_0(%arg0: i32) -> (i32, i32) {
    %c0_i32 = arith.constant 0 : i32
    %c0_i32_0 = arith.constant 0 : i32
    return %arg0, %c0_i32 : i32, i32
  }
  func.func @transform_1(%arg0: i32) -> (i32, i32) {
    %c0_i32 = arith.constant 0 : i32
    %c0_i32_0 = arith.constant 0 : i32
    %c0_i32_1 = arith.constant 0 : i32
    return %c0_i32, %c0_i32_0 : i32, i32
  }
  func.func @transform_2(%arg0: i32) -> (i32, i32) {
    %c0_i32 = arith.constant 0 : i32
    %c0_i32_0 = arith.constant 0 : i32
    %c0_i32_1 = arith.constant 0 : i32
    return %c0_i32, %c0_i32_0 : i32, i32
  }
  func.func @transform_3(%arg0: i32) -> (i32, i32) {
    %c0_i32 = arith.constant 0 : i32
    %c0_i32_0 = arith.constant 0 : i32
    %c0_i32_1 = arith.constant 0 : i32
    return %c0_i32, %c0_i32_0 : i32, i32
  }
  func.func @transform_4(%arg0: i32) -> (i32, i32) {
    %c0_i32 = arith.constant 0 : i32
    %c0_i32_0 = arith.constant 0 : i32
    %c0_i32_1 = arith.constant 0 : i32
    return %c0_i32, %c0_i32_0 : i32, i32
  }
  func.func @transform_5(%arg0: i32) -> (i32, i32) {
    %c0_i32 = arith.constant 0 : i32
    %c0_i32_0 = arith.constant 0 : i32
    %c0_i32_1 = arith.constant 0 : i32
    return %c0_i32, %c0_i32_0 : i32, i32
  }
  func.func @transform_6(%arg0: i32) -> (i32, i32) {
    %c0_i32 = arith.constant 0 : i32
    %c0_i32_0 = arith.constant 0 : i32
    %c0_i32_1 = arith.constant 0 : i32
    return %c0_i32, %c0_i32_0 : i32, i32
  }
  func.func @transform_7(%arg0: i32) -> (i32, i32) {
    %c0_i32 = arith.constant 0 : i32
    %c0_i32_0 = arith.constant 0 : i32
    return %arg0, %c0_i32 : i32, i32
  }
}

module attributes {stable_mosaic.version = 11 : i64} {
  func.func @actor_kernel(%arg0: i32, %arg1: memref<8x16xf32, #tpu.memory_space<vmem>>, %arg2: memref<16x32xf32, #tpu.memory_space<vmem>>, %arg3: memref<1x32xf32, #tpu.memory_space<vmem>>, %arg4: memref<32x32xbf16, #tpu.memory_space<vmem>>, %arg5: memref<1x32xf32, #tpu.memory_space<vmem>>, %arg6: memref<32x128xbf16, #tpu.memory_space<vmem>>, %arg7: memref<1x128xf32, #tpu.memory_space<vmem>>, %arg8: memref<8x128xf32, #tpu.memory_space<vmem>>) attributes {dimension_semantics = [#tpu.dimension_semantics<parallel>], iteration_bounds = array<i64: 1>, scalar_prefetch = 0 : i64, scratch_operands = 0 : i64, tpu.core_type = #tpu.core_type<tc>, window_params = [{transform_indices = @transform_0, window_bounds = array<i64: 8, 16>}, {pipeline_mode = #tpu.pipeline_mode<synchronous>, transform_indices = @transform_1, window_bounds = array<i64: 16, 32>}, {pipeline_mode = #tpu.pipeline_mode<synchronous>, transform_indices = @transform_2, window_bounds = array<i64: 1, 32>}, {pipeline_mode = #tpu.pipeline_mode<synchronous>, transform_indices = @transform_3, window_bounds = array<i64: 32, 32>}, {pipeline_mode = #tpu.pipeline_mode<synchronous>, transform_indices = @transform_4, window_bounds = array<i64: 1, 32>}, {pipeline_mode = #tpu.pipeline_mode<synchronous>, transform_indices = @transform_5, window_bounds = array<i64: 32, 128>}, {pipeline_mode = #tpu.pipeline_mode<synchronous>, transform_indices = @transform_6, window_bounds = array<i64: 1, 128>}, {transform_indices = @transform_7, window_bounds = array<i64: 8, 128>}]} {
    %c0 = arith.constant 0 : index
    %c0_0 = arith.constant 0 : index
    %0 = vector.load %arg1[%c0, %c0_0] : memref<8x16xf32, #tpu.memory_space<vmem>>, vector<8x16xf32>
    %c0_1 = arith.constant 0 : index
    %c0_2 = arith.constant 0 : index
    %1 = vector.load %arg2[%c0_1, %c0_2] : memref<16x32xf32, #tpu.memory_space<vmem>>, vector<16x32xf32>
    %cst = arith.constant dense<0.000000e+00> : vector<8x32xf32>
    %2 = tpu.matmul %0, %1, %cst {dimension_numbers = #tpu.dot_dimension_numbers<[1], [0], [0], [1], [0, 0, 1, 1], [], []>} : vector<8x16xf32>, vector<16x32xf32>, vector<8x32xf32> -> vector<8x32xf32>
    %c0_3 = arith.constant 0 : index
    %c0_4 = arith.constant 0 : index
    %3 = vector.load %arg3[%c0_3, %c0_4] : memref<1x32xf32, #tpu.memory_space<vmem>>, vector<1x32xf32>
    %4 = vector.broadcast %3 : vector<1x32xf32> to vector<8x32xf32>
    %5 = arith.addf %2, %4 : vector<8x32xf32>
    %cst_5 = arith.constant 0.000000e+00 : f32
    %6 = vector.broadcast %cst_5 : f32 to vector<8x32xf32>
    %7 = arith.maximumf %5, %6 : vector<8x32xf32>
    %8 = arith.truncf %7 : vector<8x32xf32> to vector<8x32xbf16>
    %c0_6 = arith.constant 0 : index
    %c0_7 = arith.constant 0 : index
    %9 = vector.load %arg4[%c0_6, %c0_7] : memref<32x32xbf16, #tpu.memory_space<vmem>>, vector<32x32xbf16>
    %cst_8 = arith.constant dense<0.000000e+00> : vector<8x32xf32>
    %10 = tpu.matmul %8, %9, %cst_8 {dimension_numbers = #tpu.dot_dimension_numbers<[1], [0], [0], [1], [0, 0, 1, 1], [], []>} : vector<8x32xbf16>, vector<32x32xbf16>, vector<8x32xf32> -> vector<8x32xf32>
    %c0_9 = arith.constant 0 : index
    %c0_10 = arith.constant 0 : index
    %11 = vector.load %arg5[%c0_9, %c0_10] : memref<1x32xf32, #tpu.memory_space<vmem>>, vector<1x32xf32>
    %12 = vector.broadcast %11 : vector<1x32xf32> to vector<8x32xf32>
    %13 = arith.addf %10, %12 : vector<8x32xf32>
    %cst_11 = arith.constant 0.000000e+00 : f32
    %14 = vector.broadcast %cst_11 : f32 to vector<8x32xf32>
    %15 = arith.maximumf %13, %14 : vector<8x32xf32>
    %16 = arith.truncf %15 : vector<8x32xf32> to vector<8x32xbf16>
    %c0_12 = arith.constant 0 : index
    %c0_13 = arith.constant 0 : index
    %17 = vector.load %arg6[%c0_12, %c0_13] : memref<32x128xbf16, #tpu.memory_space<vmem>>, vector<32x128xbf16>
    %cst_14 = arith.constant dense<0.000000e+00> : vector<8x128xf32>
    %18 = tpu.matmul %16, %17, %cst_14 {dimension_numbers = #tpu.dot_dimension_numbers<[1], [0], [0], [1], [0, 0, 1, 1], [], []>} : vector<8x32xbf16>, vector<32x128xbf16>, vector<8x128xf32> -> vector<8x128xf32>
    %c0_15 = arith.constant 0 : index
    %c0_16 = arith.constant 0 : index
    %19 = vector.load %arg7[%c0_15, %c0_16] : memref<1x128xf32, #tpu.memory_space<vmem>>, vector<1x128xf32>
    %20 = vector.broadcast %19 : vector<1x128xf32> to vector<8x128xf32>
    %21 = arith.addf %18, %20 : vector<8x128xf32>
    %22 = math.tanh %21 : vector<8x128xf32>
    %cst_17 = arith.constant 1.000000e+00 : f32
    %23 = vector.broadcast %cst_17 : f32 to vector<8x128xf32>
    %24 = arith.addf %22, %23 : vector<8x128xf32>
    %cst_18 = arith.constant 3.500000e+00 : f32
    %25 = vector.broadcast %cst_18 : f32 to vector<8x128xf32>
    %26 = arith.mulf %25, %24 : vector<8x128xf32>
    %cst_19 = arith.constant -5.000000e+00 : f32
    %27 = vector.broadcast %cst_19 : f32 to vector<8x128xf32>
    %28 = arith.addf %27, %26 : vector<8x128xf32>
    %29 = tpu.iota {dimensions = array<i32: 1>} : vector<8x128xi32>
    %c4_i32 = arith.constant 4 : i32
    %30 = vector.broadcast %c4_i32 : i32 to vector<8x128xi32>
    %31 = arith.cmpi sge, %29, %30 : vector<8x128xi32>
    %c8_i32 = arith.constant 8 : i32
    %32 = vector.broadcast %c8_i32 : i32 to vector<8x128xi32>
    %33 = arith.cmpi slt, %29, %32 : vector<8x128xi32>
    %34 = arith.andi %31, %33 : vector<8x128xi1>
    %35 = arith.select %34, %28, %21 : vector<8x128xi1>, vector<8x128xf32>
    %c0_20 = arith.constant 0 : index
    %c0_21 = arith.constant 0 : index
    %36 = vector.load %arg8[%c0_20, %c0_21] : memref<8x128xf32, #tpu.memory_space<vmem>>, vector<8x128xf32>
    tpu.vector_store %arg8[%c0_20, %c0_21], %35 {strides = array<i32>} : memref<8x128xf32, #tpu.memory_space<vmem>>, vector<8x128xf32>,
    return
  }
  func.func @transform_0(%arg0: i32) -> (i32, i32) {
    %c0_i32 = arith.constant 0 : i32
    %c0_i32_0 = arith.constant 0 : i32
    return %arg0, %c0_i32 : i32, i32
  }
  func.func @transform_1(%arg0: i32) -> (i32, i32) {
    %c0_i32 = arith.constant 0 : i32
    %c0_i32_0 = arith.constant 0 : i32
    %c0_i32_1 = arith.constant 0 : i32
    return %c0_i32, %c0_i32_0 : i32, i32
  }
  func.func @transform_2(%arg0: i32) -> (i32, i32) {
    %c0_i32 = arith.constant 0 : i32
    %c0_i32_0 = arith.constant 0 : i32
    %c0_i32_1 = arith.constant 0 : i32
    return %c0_i32, %c0_i32_0 : i32, i32
  }
  func.func @transform_3(%arg0: i32) -> (i32, i32) {
    %c0_i32 = arith.constant 0 : i32
    %c0_i32_0 = arith.constant 0 : i32
    %c0_i32_1 = arith.constant 0 : i32
    return %c0_i32, %c0_i32_0 : i32, i32
  }
  func.func @transform_4(%arg0: i32) -> (i32, i32) {
    %c0_i32 = arith.constant 0 : i32
    %c0_i32_0 = arith.constant 0 : i32
    %c0_i32_1 = arith.constant 0 : i32
    return %c0_i32, %c0_i32_0 : i32, i32
  }
  func.func @transform_5(%arg0: i32) -> (i32, i32) {
    %c0_i32 = arith.constant 0 : i32
    %c0_i32_0 = arith.constant 0 : i32
    %c0_i32_1 = arith.constant 0 : i32
    return %c0_i32, %c0_i32_0 : i32, i32
  }
  func.func @transform_6(%arg0: i32) -> (i32, i32) {
    %c0_i32 = arith.constant 0 : i32
    %c0_i32_0 = arith.constant 0 : i32
    %c0_i32_1 = arith.constant 0 : i32
    return %c0_i32, %c0_i32_0 : i32, i32
  }
  func.func @transform_7(%arg0: i32) -> (i32, i32) {
    %c0_i32 = arith.constant 0 : i32
    %c0_i32_0 = arith.constant 0 : i32
    return %arg0, %c0_i32 : i32, i32
  }
}

</mosaic_0001>

<bundles_post_ra>
// kernel: tpu_custom_call.1
= control target key start
LH: loop header
LB: loop body
LE: loop exit
PB: predicated region body
PF: predicated region fallthrough
CT: control target
= control target key end

     0   :  { %12 = vsyncpa [#allocation3], 0  ;;  %s587_s0 = inlined_call_operand.hbm [shape: f32[8,16], index: 0, kind: input, shape index: {}]   ;;  %s588_s1 = inlined_call_operand.hbm [shape: f32[16,32], index: 1, kind: input, shape index: {}]   ;;  %s589_s2 = inlined_call_operand.vmem [shape: f32[1,32], index: 2, kind: input, shape index: {}]   ;;  %s590_s3 = inlined_call_operand.hbm [shape: bf16[32,32], index: 3, kind: input, shape index: {}]   ;;  %s591_s4 = inlined_call_operand.vmem [shape: f32[1,32], index: 4, kind: input, shape index: {}]   ;;  %s592_s5 = inlined_call_operand.vmem [shape: bf16[32,128], index: 5, kind: input, shape index: {}]   ;;  %s593_s6 = inlined_call_operand.vmem [shape: f32[1,128], index: 6, kind: input, shape index: {}]   ;;  %s594_s7 = inlined_call_operand.hbm [shape: f32[8,128], index: 7, kind: output, shape index: {}]  }
   0x1   :  { %13 = vsyncpa [#allocation6], 0 }
   0x2   :  { %14 = vsyncpa [#allocation4], 0  ;;  %s471_s24 = smov [#allocation5]   ;;  %s377_s28 = scalar_lea.hbm %s588_s1, 256 }
   0x3   :  { %s30_s25 = sshll.u32 %s471_s24, 4  ;;  %p378_p0 = scmp.ne.s32.totalorder %s588_s1, %s377_s28  ;;  %s31_s25 = int_to_ptr.vmem [resolvable:$true] %s30_s25 }
   0x4   :  { %p381_p1 = scmp.lt.u32.totalorder %s377_s28, %s588_s1 }
   0x6   :  { %p383_p2 = pnand %p381_p1, %p378_p0 }
   0x8   :  { %386 = shalt.err (!%p383_p2)
}
   0x9   :  { %s387_s10 = scalar_lea.vmem %s31_s25, 256  ;;  %p392_p4 = scmp.lt.s32.totalorder %s31_s25, %s31_s25 }
   0xa   :  { %p388_p3 = scmp.ne.s32.totalorder %s31_s25, %s387_s10  ;;  %p393_p5 = scmp.lt.s32.totalorder %s387_s10, %s387_s10 }
   0xc   :  { %p394_p6 = por %p393_p5, %p392_p4 }
   0xe   :  { %p395_p7 = pnand %p394_p6, %p388_p3 }
  0x10   :  { %398 = shalt.err (!%p395_p7)
}
  0x11   :  { %s472_s11 = smov 128   ;;  %s473_s12 = smov 8  }
  0x12   :  { %36 = dma.hbm_to_vmem [thread:$0]  %s588_s1, 256, %s31_s25, [#allocation6], %s472_s11, %s472_s11, %s473_s12  }
  0x13   :  { %s474_s15 = smov [#allocation2]   ;;  %s475_s17 = smov [#allocation7]  }
  0x14   :  { %s21_s16 = sshll.u32 %s474_s15, 4  ;;  %s44_s18 = sshll.u32 %s475_s17, 4  ;;  %s22_s16 = int_to_ptr.vmem [resolvable:$true] %s21_s16  ;;  %s45_s18 = int_to_ptr.vmem [resolvable:$true] %s44_s18 }
  0x15   :  { %s399_s21 = scalar_lea.hbm %s587_s0, 128 }
  0x16   :  { %p400_p8 = scmp.ne.s32.totalorder %s587_s0, %s399_s21  ;;  %p403_p9 = scmp.lt.u32.totalorder %s399_s21, %s587_s0 }
  0x18   :  { %p405_p10 = pnand %p403_p9, %p400_p8 }
  0x1a   :  { %408 = shalt.err (!%p405_p10)
}
  0x1b   :  { %s409_s1 = scalar_lea.vmem %s22_s16, 128  ;;  %p414_p12 = scmp.lt.s32.totalorder %s22_s16, %s22_s16 }
  0x1c   :  { %p410_p11 = scmp.ne.s32.totalorder %s22_s16, %s409_s1  ;;  %p415_p13 = scmp.lt.s32.totalorder %s409_s1, %s409_s1 }
  0x1e   :  { %p416_p0 = por %p415_p13, %p414_p12 }
  0x20   :  { %p417_p1 = pnand %p416_p0, %p410_p11 }
  0x22   :  { %420 = shalt.err (!%p417_p1)
}
  0x23   :  { %24 = dma.hbm_to_vmem [thread:$0]  %s587_s0, 128, %s22_s16, [#allocation3]  }
  0x24   :  { %s421_s30 = scalar_lea.hbm %s590_s3, 256 }
  0x25   :  { %p422_p2 = scmp.ne.s32.totalorder %s590_s3, %s421_s30  ;;  %p425_p3 = scmp.lt.u32.totalorder %s421_s30, %s590_s3 }
  0x27   :  { %p427_p4 = pnand %p425_p3, %p422_p2 }
  0x29   :  { %430 = shalt.err (!%p427_p4)
}
  0x2a   :  { %s431_s12 = scalar_lea.vmem %s45_s18, 256  ;;  %p436_p6 = scmp.lt.s32.totalorder %s45_s18, %s45_s18 }
  0x2b   :  { %p432_p5 = scmp.ne.s32.totalorder %s45_s18, %s431_s12  ;;  %p437_p7 = scmp.lt.s32.totalorder %s431_s12, %s431_s12 }
  0x2d   :  { %p438_p8 = por %p437_p7, %p436_p6 }
  0x2f   :  { %p439_p9 = pnand %p438_p8, %p432_p5 }
  0x31   :  { %442 = shalt.err (!%p439_p9)
}
  0x32   :  { %s476_s0 = smov 64   ;;  %s477_s13 = smov 4  }
  0x33   :  { %50 = dma.hbm_to_vmem [thread:$0]  %s590_s3, 256, %s45_s18, [#allocation6], %s476_s0, %s476_s0, %s477_s13  }
  0x34   :  { %465 = dma.done.wait [#allocation3], 128  }
  0x35   :  { %466 = vsyncadd [#allocation3], 4294967168 }
  0x36   :  { %467 = dma.done.wait [#allocation6], 512  }
  0x37   :  { %468 = vsyncadd [#allocation6], 4294966784  ;;  %v478_v0 = vmov 0.0|0.0   ;;  %vm479_vm0 = vmmov 0   ;;  %v480_v1 = vmov 0.0   ;;  %v68_v2 = vld [vmem:[#allocation5] sm:$0xff]  ;;  %v292_v30 = vlaneseq }
  0x38   :  { %357 = vmatprep.subr.bf16.mxu0 %v478_v0  ;;  %338 = vmatprep.mubr.msk.f32.mxu0 %vm479_vm0, %v480_v1  ;;  %v69_v3 = vld [vmem:[#allocation5 + $0x8] sm:$0xff]  ;;  %v67_v5 = vld [vmem:[#allocation2] sm:$0xff]  ;;  %vm77_vm1 = vcmask 130048   ;;  %v371_v6 = vld [vmem:[#allocation7] sm:$0xff]   ;;  %vm176_vm2 = vcmask 261120  }
  0x39   :  { %341 = vmatprep.subr.bf16.mxu1 %v480_v1  ;;  %345 = vmatprep.mubr.msk.bf16.mxu1 %vm479_vm0, %v480_v1  ;;  %v358_v4 = vpack.c.bf16 %v69_v3, %v68_v2  ;;  %v372_v7 = vld [vmem:[#allocation7 + $0x8] sm:$0xff]   ;;  %v315_v8 = vld [vmem:[%s589_s2] ss:$0 sm:$0xff]  ;;  %v374_v15 = vld [vmem:[%s592_s5 + $0x8] sm:$0xff]   ;;  %v293_v31 = vand.u32 127, %v292_v30 }
  0x3a   :  { %342 = vmatpush3.bf16.msra.mxu1 %v371_v6  ;;  %v373_v14 = vld [vmem:[%s592_s5] sm:$0xff]  }
  0x3b   :  { %359 = vmatpush3.bf16.msra.mxu0 %v358_v4  ;;  %343 = vmatprep.subr.bf16.mxu1 %v480_v1  ;;  %v317_v16 = vld [vmem:[%s591_s4] ss:$0 sm:$0xff]  ;;  %vm294_vm3 = vcmp.ge.s32.totalorder %v293_v31, 4  ;;  %vm295_vm4 = vcmp.lt.s32.totalorder %v293_v31, 8  ;;  %s481_s4 = smov [#allocation8]  }
  0x3c   :  { %349 = vmatprep.subr.bf16.mxu0 %v480_v1  ;;  %v321_v24 = vld [vmem:[%s593_s6] ss:$0 sm:$0xff]  ;;  %s305_s5 = sshll.u32 %s481_s4, 4  ;;  %vm296_vm5 = vmand %vm294_vm3, %vm295_vm4  ;;  %s306_s5 = int_to_ptr.vmem [resolvable:$true] %s305_s5 }
  0x3d   :  { %s443_s6 = scalar_lea.vmem %s306_s5, 128  ;;  %p448_p11 = scmp.lt.s32.totalorder %s306_s5, %s306_s5 }
  0x3e   :  { %339 = vmatmul.mubr.msk.f32.vlgmr.msra.gmra.mrb[0].mxu0 %vm77_vm1, %v67_v5  ;;  %344 = vmatpush3.bf16.msra.mxu1 %v372_v7  ;;  %p444_p10 = scmp.ne.s32.totalorder %s306_s5, %s443_s6  ;;  %p449_p12 = scmp.lt.s32.totalorder %s443_s6, %s443_s6 }
  0x3f   :  { %353 = vmatprep.mubr.msk.bf16.mxu0 %vm479_vm0, %v480_v1  ;;  %350 = vmatpush3.bf16.msra.mxu0 %v373_v14 }
  0x40   :  { %351 = vmatprep.subr.bf16.mxu0 %v480_v1  ;;  %p450_p13 = por %p449_p12, %p448_p11 }
  0x42   :  { %p451_p0 = pnand %p450_p13, %p444_p10 }
  0x43   :  { %352 = vmatpush3.bf16.msra.mxu0 %v374_v15 }
 0x111   :  { %v147_v9 = vpop.f32.mrb[0].mxu0 }
 0x112   :  { %v148_v10 = vadd.f32 %v315_v8, %v147_v9  ;;  %v340_v11 = vpop.f32.mrb[1].mxu0 }
 0x114   :  { %v151_v12 = vmax.f32 %v148_v10, 0.0 }
 0x116   :  { %v152_v13 = vpack.c.bf16 %v151_v12, %v151_v12 }
 0x118   :  { %346 = vmatmul.mubr.msk.bf16.vlgmr.msra.gmra.mrb[0].mxu1 %vm176_vm2, %v152_v13 }
 0x1eb   :  { %v214_v17 = vpop.f32.mrb[0].mxu1 }
 0x1ec   :  { %v215_v18 = vadd.f32 %v317_v16, %v214_v17  ;;  %v347_v19 = vpop.f32.mrb[1].mxu1 }
 0x1ed   :  { %v217_v20 = vpop.f32.mrb[2].mxu1 }
 0x1ee   :  { %v220_v21 = vmax.f32 %v215_v18, 0.0  ;;  %v348_v22 = vpop.f32.mrb[3].mxu1 }
 0x1f0   :  { %v221_v23 = vpack.c.bf16 %v220_v21, %v220_v21 }
 0x1f2   :  { %354 = vmatmul.mubr.msk.bf16.vlgmr.msra.gmra.mrb[4].mxu0 %vm176_vm2, %v221_v23 }
 0x2c5   :  { %v282_v25 = vpop.f32.mrb[4].mxu0 }
 0x2c6   :  { %v283_v26 = vadd.f32 %v321_v24, %v282_v25  ;;  %v355_v27 = vpop.f32.mrb[5].mxu0 }
 0x2c7   :  { %v285_v28 = vpop.f32.mrb[6].mxu0 }
 0x2c8   :  { %375 = vtanh.f32 %v283_v26  ;;  %v356_v29 = vpop.f32.mrb[7].mxu0 }
 0x2d2   :  { %v376_v32 = vpop.eup %375 }
 0x2d3   :  { %v289_v33 = vadd.f32 1.0, %v376_v32 }
 0x2d5   :  { %v290_v34 = vmul.f32 3.5, %v289_v33 }
 0x2d7   :  { %v291_v35 = vadd.f32 -5.0, %v290_v34 }
 0x2d9   :  { %v297_v36 = vsel %vm296_vm5, %v291_v35, %v283_v26 }
 0x2da   :  { %298 = vst [vmem:[#allocation8] sm:$0xff] %v297_v36 }
 0x2db   :  { %454 = shalt.err (!%p451_p0)
}
 0x2dc   :  { %s455_s1 = scalar_lea.hbm %s594_s7, 128 }
 0x2dd   :  { %p456_p1 = scmp.ne.s32.totalorder %s594_s7, %s455_s1  ;;  %p459_p2 = scmp.lt.u32.totalorder %s455_s1, %s594_s7 }
 0x2df   :  { %p461_p3 = pnand %p459_p2, %p456_p1 }
 0x2e1   :  { %464 = shalt.err (!%p461_p3)
}
 0x2e2   :  { %308 = dma.vmem_to_hbm [thread:$0]  %s306_s5, 128, %s594_s7, [#allocation4]  }
 0x2e3   :  { %469 = dma.done.wait [#allocation4], 128  }
 0x2e4   :  { %470 = vsyncadd [#allocation4], 4294967168 }
 0x2e5   :  { %312 = vsyncpa [#allocation3], 1 }
 0x2e6   :  { %313 = vsyncpa [#allocation6], 1 }
 0x2e7   :  { %314 = vsyncpa [#allocation4], 1 }

// kernel: tpu_custom_call.1
= control target key start
LH: loop header
LB: loop body
LE: loop exit
PB: predicated region body
PF: predicated region fallthrough
CT: control target
= control target key end

     0   :  { %12 = vsyncpa [#allocation3], 0  ;;  %s587_s0 = inlined_call_operand.hbm [shape: f32[8,16], index: 0, kind: input, shape index: {}]   ;;  %s588_s1 = inlined_call_operand.hbm [shape: f32[16,32], index: 1, kind: input, shape index: {}]   ;;  %s589_s2 = inlined_call_operand.vmem [shape: f32[1,32], index: 2, kind: input, shape index: {}]   ;;  %s590_s3 = inlined_call_operand.hbm [shape: bf16[32,32], index: 3, kind: input, shape index: {}]   ;;  %s591_s4 = inlined_call_operand.vmem [shape: f32[1,32], index: 4, kind: input, shape index: {}]   ;;  %s592_s5 = inlined_call_operand.vmem [shape: bf16[32,128], index: 5, kind: input, shape index: {}]   ;;  %s593_s6 = inlined_call_operand.vmem [shape: f32[1,128], index: 6, kind: input, shape index: {}]   ;;  %s594_s7 = inlined_call_operand.hbm [shape: f32[8,128], index: 7, kind: output, shape index: {}]  }
   0x1   :  { %13 = vsyncpa [#allocation6], 0 }
   0x2   :  { %14 = vsyncpa [#allocation4], 0  ;;  %s471_s24 = smov [#allocation5]   ;;  %s377_s28 = scalar_lea.hbm %s588_s1, 256 }
   0x3   :  { %s30_s25 = sshll.u32 %s471_s24, 4  ;;  %p378_p0 = scmp.ne.s32.totalorder %s588_s1, %s377_s28  ;;  %s31_s25 = int_to_ptr.vmem [resolvable:$true] %s30_s25 }
   0x4   :  { %p381_p1 = scmp.lt.u32.totalorder %s377_s28, %s588_s1 }
   0x6   :  { %p383_p2 = pnand %p381_p1, %p378_p0 }
   0x8   :  { %386 = shalt.err (!%p383_p2)
}
   0x9   :  { %s387_s10 = scalar_lea.vmem %s31_s25, 256  ;;  %p392_p4 = scmp.lt.s32.totalorder %s31_s25, %s31_s25 }
   0xa   :  { %p388_p3 = scmp.ne.s32.totalorder %s31_s25, %s387_s10  ;;  %p393_p5 = scmp.lt.s32.totalorder %s387_s10, %s387_s10 }
   0xc   :  { %p394_p6 = por %p393_p5, %p392_p4 }
   0xe   :  { %p395_p7 = pnand %p394_p6, %p388_p3 }
  0x10   :  { %398 = shalt.err (!%p395_p7)
}
  0x11   :  { %s472_s11 = smov 128   ;;  %s473_s12 = smov 8  }
  0x12   :  { %36 = dma.hbm_to_vmem [thread:$0]  %s588_s1, 256, %s31_s25, [#allocation6], %s472_s11, %s472_s11, %s473_s12  }
  0x13   :  { %s474_s15 = smov [#allocation2]   ;;  %s475_s17 = smov [#allocation7]  }
  0x14   :  { %s21_s16 = sshll.u32 %s474_s15, 4  ;;  %s44_s18 = sshll.u32 %s475_s17, 4  ;;  %s22_s16 = int_to_ptr.vmem [resolvable:$true] %s21_s16  ;;  %s45_s18 = int_to_ptr.vmem [resolvable:$true] %s44_s18 }
  0x15   :  { %s399_s21 = scalar_lea.hbm %s587_s0, 128 }
  0x16   :  { %p400_p8 = scmp.ne.s32.totalorder %s587_s0, %s399_s21  ;;  %p403_p9 = scmp.lt.u32.totalorder %s399_s21, %s587_s0 }
  0x18   :  { %p405_p10 = pnand %p403_p9, %p400_p8 }
  0x1a   :  { %408 = shalt.err (!%p405_p10)
}
  0x1b   :  { %s409_s1 = scalar_lea.vmem %s22_s16, 128  ;;  %p414_p12 = scmp.lt.s32.totalorder %s22_s16, %s22_s16 }
  0x1c   :  { %p410_p11 = scmp.ne.s32.totalorder %s22_s16, %s409_s1  ;;  %p415_p13 = scmp.lt.s32.totalorder %s409_s1, %s409_s1 }
  0x1e   :  { %p416_p0 = por %p415_p13, %p414_p12 }
  0x20   :  { %p417_p1 = pnand %p416_p0, %p410_p11 }
  0x22   :  { %420 = shalt.err (!%p417_p1)
}
  0x23   :  { %24 = dma.hbm_to_vmem [thread:$0]  %s587_s0, 128, %s22_s16, [#allocation3]  }
  0x24   :  { %s421_s30 = scalar_lea.hbm %s590_s3, 256 }
  0x25   :  { %p422_p2 = scmp.ne.s32.totalorder %s590_s3, %s421_s30  ;;  %p425_p3 = scmp.lt.u32.totalorder %s421_s30, %s590_s3 }
  0x27   :  { %p427_p4 = pnand %p425_p3, %p422_p2 }
  0x29   :  { %430 = shalt.err (!%p427_p4)
}
  0x2a   :  { %s431_s12 = scalar_lea.vmem %s45_s18, 256  ;;  %p436_p6 = scmp.lt.s32.totalorder %s45_s18, %s45_s18 }
  0x2b   :  { %p432_p5 = scmp.ne.s32.totalorder %s45_s18, %s431_s12  ;;  %p437_p7 = scmp.lt.s32.totalorder %s431_s12, %s431_s12 }
  0x2d   :  { %p438_p8 = por %p437_p7, %p436_p6 }
  0x2f   :  { %p439_p9 = pnand %p438_p8, %p432_p5 }
  0x31   :  { %442 = shalt.err (!%p439_p9)
}
  0x32   :  { %s476_s0 = smov 64   ;;  %s477_s13 = smov 4  }
  0x33   :  { %50 = dma.hbm_to_vmem [thread:$0]  %s590_s3, 256, %s45_s18, [#allocation6], %s476_s0, %s476_s0, %s477_s13  }
  0x34   :  { %465 = dma.done.wait [#allocation3], 128  }
  0x35   :  { %466 = vsyncadd [#allocation3], 4294967168 }
  0x36   :  { %467 = dma.done.wait [#allocation6], 512  }
  0x37   :  { %468 = vsyncadd [#allocation6], 4294966784  ;;  %v478_v0 = vmov 0.0|0.0   ;;  %vm479_vm0 = vmmov 0   ;;  %v480_v1 = vmov 0.0   ;;  %v68_v2 = vld [vmem:[#allocation5] sm:$0xff]  ;;  %v292_v30 = vlaneseq }
  0x38   :  { %357 = vmatprep.subr.bf16.mxu0 %v478_v0  ;;  %338 = vmatprep.mubr.msk.f32.mxu0 %vm479_vm0, %v480_v1  ;;  %v69_v3 = vld [vmem:[#allocation5 + $0x8] sm:$0xff]  ;;  %v67_v5 = vld [vmem:[#allocation2] sm:$0xff]  ;;  %vm77_vm1 = vcmask 130048   ;;  %v371_v6 = vld [vmem:[#allocation7] sm:$0xff]   ;;  %vm176_vm2 = vcmask 261120  }
  0x39   :  { %341 = vmatprep.subr.bf16.mxu1 %v480_v1  ;;  %345 = vmatprep.mubr.msk.bf16.mxu1 %vm479_vm0, %v480_v1  ;;  %v358_v4 = vpack.c.bf16 %v69_v3, %v68_v2  ;;  %v372_v7 = vld [vmem:[#allocation7 + $0x8] sm:$0xff]   ;;  %v315_v8 = vld [vmem:[%s589_s2] ss:$0 sm:$0xff]  ;;  %v374_v15 = vld [vmem:[%s592_s5 + $0x8] sm:$0xff]   ;;  %v293_v31 = vand.u32 127, %v292_v30 }
  0x3a   :  { %342 = vmatpush3.bf16.msra.mxu1 %v371_v6  ;;  %v373_v14 = vld [vmem:[%s592_s5] sm:$0xff]  }
  0x3b   :  { %359 = vmatpush3.bf16.msra.mxu0 %v358_v4  ;;  %343 = vmatprep.subr.bf16.mxu1 %v480_v1  ;;  %v317_v16 = vld [vmem:[%s591_s4] ss:$0 sm:$0xff]  ;;  %vm294_vm3 = vcmp.ge.s32.totalorder %v293_v31, 4  ;;  %vm295_vm4 = vcmp.lt.s32.totalorder %v293_v31, 8  ;;  %s481_s4 = smov [#allocation8]  }
  0x3c   :  { %349 = vmatprep.subr.bf16.mxu0 %v480_v1  ;;  %v321_v24 = vld [vmem:[%s593_s6] ss:$0 sm:$0xff]  ;;  %s305_s5 = sshll.u32 %s481_s4, 4  ;;  %vm296_vm5 = vmand %vm294_vm3, %vm295_vm4  ;;  %s306_s5 = int_to_ptr.vmem [resolvable:$true] %s305_s5 }
  0x3d   :  { %s443_s6 = scalar_lea.vmem %s306_s5, 128  ;;  %p448_p11 = scmp.lt.s32.totalorder %s306_s5, %s306_s5 }
  0x3e   :  { %339 = vmatmul.mubr.msk.f32.vlgmr.msra.gmra.mrb[0].mxu0 %vm77_vm1, %v67_v5  ;;  %344 = vmatpush3.bf16.msra.mxu1 %v372_v7  ;;  %p444_p10 = scmp.ne.s32.totalorder %s306_s5, %s443_s6  ;;  %p449_p12 = scmp.lt.s32.totalorder %s443_s6, %s443_s6 }
  0x3f   :  { %353 = vmatprep.mubr.msk.bf16.mxu0 %vm479_vm0, %v480_v1  ;;  %350 = vmatpush3.bf16.msra.mxu0 %v373_v14 }
  0x40   :  { %351 = vmatprep.subr.bf16.mxu0 %v480_v1  ;;  %p450_p13 = por %p449_p12, %p448_p11 }
  0x42   :  { %p451_p0 = pnand %p450_p13, %p444_p10 }
  0x43   :  { %352 = vmatpush3.bf16.msra.mxu0 %v374_v15 }
 0x111   :  { %v147_v9 = vpop.f32.mrb[0].mxu0 }
 0x112   :  { %v148_v10 = vadd.f32 %v315_v8, %v147_v9  ;;  %v340_v11 = vpop.f32.mrb[1].mxu0 }
 0x114   :  { %v151_v12 = vmax.f32 %v148_v10, 0.0 }
 0x116   :  { %v152_v13 = vpack.c.bf16 %v151_v12, %v151_v12 }
 0x118   :  { %346 = vmatmul.mubr.msk.bf16.vlgmr.msra.gmra.mrb[0].mxu1 %vm176_vm2, %v152_v13 }
 0x1eb   :  { %v214_v17 = vpop.f32.mrb[0].mxu1 }
 0x1ec   :  { %v215_v18 = vadd.f32 %v317_v16, %v214_v17  ;;  %v347_v19 = vpop.f32.mrb[1].mxu1 }
 0x1ed   :  { %v217_v20 = vpop.f32.mrb[2].mxu1 }
 0x1ee   :  { %v220_v21 = vmax.f32 %v215_v18, 0.0  ;;  %v348_v22 = vpop.f32.mrb[3].mxu1 }
 0x1f0   :  { %v221_v23 = vpack.c.bf16 %v220_v21, %v220_v21 }
 0x1f2   :  { %354 = vmatmul.mubr.msk.bf16.vlgmr.msra.gmra.mrb[4].mxu0 %vm176_vm2, %v221_v23 }
 0x2c5   :  { %v282_v25 = vpop.f32.mrb[4].mxu0 }
 0x2c6   :  { %v283_v26 = vadd.f32 %v321_v24, %v282_v25  ;;  %v355_v27 = vpop.f32.mrb[5].mxu0 }
 0x2c7   :  { %v285_v28 = vpop.f32.mrb[6].mxu0 }
 0x2c8   :  { %375 = vtanh.f32 %v283_v26  ;;  %v356_v29 = vpop.f32.mrb[7].mxu0 }
 0x2d2   :  { %v376_v32 = vpop.eup %375 }
 0x2d3   :  { %v289_v33 = vadd.f32 1.0, %v376_v32 }
 0x2d5   :  { %v290_v34 = vmul.f32 3.5, %v289_v33 }
 0x2d7   :  { %v291_v35 = vadd.f32 -5.0, %v290_v34 }
 0x2d9   :  { %v297_v36 = vsel %vm296_vm5, %v291_v35, %v283_v26 }
 0x2da   :  { %298 = vst [vmem:[#allocation8] sm:$0xff] %v297_v36 }
 0x2db   :  { %454 = shalt.err (!%p451_p0)
}
 0x2dc   :  { %s455_s1 = scalar_lea.hbm %s594_s7, 128 }
 0x2dd   :  { %p456_p1 = scmp.ne.s32.totalorder %s594_s7, %s455_s1  ;;  %p459_p2 = scmp.lt.u32.totalorder %s455_s1, %s594_s7 }
 0x2df   :  { %p461_p3 = pnand %p459_p2, %p456_p1 }
 0x2e1   :  { %464 = shalt.err (!%p461_p3)
}
 0x2e2   :  { %308 = dma.vmem_to_hbm [thread:$0]  %s306_s5, 128, %s594_s7, [#allocation4]  }
 0x2e3   :  { %469 = dma.done.wait [#allocation4], 128  }
 0x2e4   :  { %470 = vsyncadd [#allocation4], 4294967168 }
 0x2e5   :  { %312 = vsyncpa [#allocation3], 1 }
 0x2e6   :  { %313 = vsyncpa [#allocation6], 1 }
 0x2e7   :  { %314 = vsyncpa [#allocation4], 1 }

</bundles_post_ra>
